<compile_context>
chip_gen: v7x
topology: tpu7x:2x2x1
jax: 0.10.0
libtpu: 0.0.40
codegen_flags: <defaults>
</compile_context>

<pallas_src>
import functools

import jax
import jax.numpy as jnp
import numpy as np
from jax import lax
from jax.experimental import pallas as pl
from jax.experimental.pallas import tpu as pltpu

EPS = 1e-6


def _round_up(v, m):
    return ((v + m - 1) // m) * m


def _choose_n_tile(n, max_tile):
    """Lane tile (multiple of 128) and padded N (multiple of the tile)."""
    n128 = _round_up(n, 128)
    if n128 <= max_tile:
        return n128, n128
    return max_tile, _round_up(n, max_tile)


def _stats_kernel(x_ref, w_ref, b_ref, qn_ref, stats_ref, *,
                  cq, n_valid, n_pad, tn, nth):
    """Pass 1: fused QKV(+ones) matmul, l2-norm, accumulate global stats."""
    t = pl.program_id(2)

    @pl.when(t == 0)
    def _init():
        stats_ref[...] = jnp.zeros_like(stats_ref)

    x = x_ref[0]                                                   # (C, TN)
    # Fused 1x1 convs + ones row: single (2*Cq+C+1, C) @ (C, TN) MXU matmul.
    qkv = jnp.dot(w_ref[...], x,
                  preferred_element_type=jnp.float32) + b_ref[...]
    q = qkv[:cq]                                                   # (Cq, TN)
    k = qkv[cq:2 * cq]                                             # (Cq, TN)
    v_aug = qkv[2 * cq:]                                           # (C+1, TN); last row == 1

    # l2-norm over channels; rsqrt goes to the EUP slot.
    qn = q * lax.rsqrt(jnp.sum(q * q, axis=0, keepdims=True))
    kn = k * lax.rsqrt(jnp.sum(k * k, axis=0, keepdims=True))
    qn_ref[0] = qn.astype(qn_ref.dtype)

    kn_aug = jnp.concatenate([kn, jnp.ones((1, tn), jnp.float32)],
                             axis=0)                               # (Cq+1, TN)

    if n_pad != n_valid:                                           # static branch
        # Masking only Kn_aug (Cq+1 rows) is sufficient: zero columns remove
        # padded positions from matrix, v_sum, k_sum and the count cell.
        h = pl.program_id(1)
        col = (h * nth + t) * tn + lax.broadcasted_iota(jnp.int32, (1, tn), 1)
        kn_aug = jnp.where(col < n_valid, kn_aug, 0.0)

    # One matmul yields:
    #   stats[:C, :Cq] = sum_n V*Kn (matrix^T), stats[:C, Cq] = value_sum,
    #   stats[ C, :Cq] = key_sum,               stats[ C, Cq] = N_valid.
    contrib = lax.dot_general(v_aug, kn_aug, (((1,), (1,)), ((), ())),
                              preferred_element_type=jnp.float32)  # (C+1, Cq+1)
    stats_ref[0] = stats_ref[0] + contrib


def _apply_kernel(qn_ref, stats_ref, o_ref, *, c, tn):
    """Pass 2: one fused dot gives numerator and tailor denominator."""
    qn_aug = jnp.concatenate(
        [qn_ref[0], jnp.ones((1, tn), jnp.float32)], axis=0)       # (Cq+1, TN)
    # stats already has gamma folded into rows :C and EPS into the k_sum row.
    res = jnp.dot(stats_ref[0], qn_aug,
                  preferred_element_type=jnp.float32)              # (C+1, TN)
    num = res[:c]                                                  # gamma*(qm + v_sum)
    den = res[c:c + 1]                                             # N + Qn.(k_sum+eps)
    inv = pl.reciprocal(den)  # exact; approx=True possible if tolerance allows
    o_ref[0] = (num * inv).astype(o_ref.dtype)


def attention_forward(x_nchw, wq, bq, wk, bk, wv, bv, gamma, *,
                      max_n_tile=8192):
    """x_nchw: (B, C, W, H) float32. Returns (B, C, H, W) float32."""
    B, C, W, H = x_nchw.shape
    N = W * H
    Cq = wq.shape[0]
    CT = 2 * Cq + C + 1          # stacked Q, K, V rows + one "ones" row

    TN, N_pad = _choose_n_tile(N, max_n_tile)
    NT = N_pad // TN
    NH = 2 if (NT % 2 == 0 and NT >= 2) else 1     # megacore split (v7x)
    NTH = NT // NH

    x_flat = x_nchw.reshape(B, C, N).astype(jnp.float32)
    if N_pad != N:
        x_flat = jnp.pad(x_flat, ((0, 0), (0, 0), (0, N_pad - N)))

    # Stacked 1x1-conv weights; trailing all-zero row with bias 1.0 emits the
    # ones row of v_aug directly from the fused matmul.
    w_stk = jnp.concatenate(
        [wq, wk, wv, jnp.zeros((1, C), jnp.float32)], axis=0).astype(jnp.float32)
    b_stk = jnp.concatenate(
        [bq, bk, bv, jnp.ones((1,), jnp.float32)],
        axis=0).reshape(CT, 1).astype(jnp.float32)

    # ---- pass 1: per-tile QKV + global statistics --------------------------
    qn_store, stats = pl.pallas_call(
        functools.partial(_stats_kernel, cq=Cq, n_valid=N, n_pad=N_pad,
                          tn=TN, nth=NTH),
        out_shape=(
            jax.ShapeDtypeStruct((B, Cq, N_pad), jnp.float32),
            jax.ShapeDtypeStruct((B * NH, C + 1, Cq + 1), jnp.float32),
        ),
        grid_spec=pltpu.PrefetchScalarGridSpec(
            num_scalar_prefetch=0,
            grid=(B, NH, NTH),
            in_specs=[
                pl.BlockSpec((1, C, TN), lambda b, h, t: (b, 0, h * NTH + t)),
                pl.BlockSpec((CT, C), lambda b, h, t: (0, 0)),
                pl.BlockSpec((CT, 1), lambda b, h, t: (0, 0)),
            ],
            out_specs=[
                pl.BlockSpec((1, Cq, TN), lambda b, h, t: (b, 0, h * NTH + t)),
                pl.BlockSpec((1, C + 1, Cq + 1),
                             lambda b, h, t: (b * NH + h, 0, 0)),
            ],
        ),
        compiler_params=pltpu.CompilerParams(
            dimension_semantics=("parallel", "parallel", "arbitrary")),
    )(x_flat, w_stk, b_stk)

    # Tiny (B, NH, C+1, Cq+1) reductions/folds done in the wrapper:
    #   * sum the per-half statistics,
    #   * add EPS to the k_sum row (reference adds eps before the dot),
    #   * fold gamma into the numerator rows so pass 2 needs no gamma input.
    g = jnp.asarray(gamma, jnp.float32).reshape(())
    stats2 = jnp.sum(stats.reshape(B, NH, C + 1, Cq + 1), axis=1)
    stats2 = stats2.at[:, C, :Cq].add(EPS)
    stats2 = stats2.at[:, :C, :].multiply(g)

    # ---- pass 2: apply statistics, write lane-dense output tiles -----------
    out_flat = pl.pallas_call(
        functools.partial(_apply_kernel, c=C, tn=TN),
        out_shape=jax.ShapeDtypeStruct((B, C, N_pad), jnp.float32),
        grid_spec=pltpu.PrefetchScalarGridSpec(
            num_scalar_prefetch=0,
            grid=(B, NT),
            in_specs=[
                pl.BlockSpec((1, Cq, TN), lambda b, t: (b, 0, t)),          # Qn
                pl.BlockSpec((1, C + 1, Cq + 1), lambda b, t: (b, 0, 0)),   # stats
            ],
            out_specs=pl.BlockSpec((1, C, TN), lambda b, t: (b, 0, t)),
        ),
        compiler_params=pltpu.CompilerParams(
            dimension_semantics=("parallel", "parallel")),
    )(qn_store, stats2)

    if N_pad != N:
        out_flat = out_flat[:, :, :N]
    # weight_value.view(batch, channels, height, width)
    return out_flat.reshape(B, C, H, W)


def attention_reference(x_nchw, wq, bq, wk, bk, wv, bv, gamma):
    """Pure-JAX reference mirroring the PyTorch forward pass."""
    B, C, W, H = x_nchw.shape
    N = W * H
    x = x_nchw.reshape(B, C, N)
    hp = lax.Precision.HIGHEST

    Q = jnp.einsum('oc,bcn->bon', wq, x, precision=hp) + bq[None, :, None]
    K = jnp.einsum('oc,bcn->bon', wk, x, precision=hp) + bk[None, :, None]
    V = jnp.einsum('oc,bcn->bon', wv, x, precision=hp) + bv[None, :, None]

    def l2n(t):
        return t / jnp.linalg.norm(t, ord=2, axis=-2, keepdims=True)

    Qn = jnp.transpose(l2n(Q), (0, 2, 1))      # (B, N, Cq)
    Kn = l2n(K)                                # (B, Cq, N)

    tailor = 1.0 / (N + jnp.einsum('bnc,bc->bn', Qn,
                                   jnp.sum(Kn, axis=-1) + EPS, precision=hp))
    v_sum = jnp.einsum('bcn->bc', V)[:, :, None]
    matrix = jnp.einsum('bmn,bcn->bmc', Kn, V, precision=hp)
    matrix_sum = v_sum + jnp.einsum('bnm,bmc->bcn', Qn, matrix, precision=hp)
    wv_out = matrix_sum * tailor[:, None, :]
    return (gamma * wv_out).reshape(B, C, H, W)


def _run_case(B, C, W, H, scale, max_n_tile):
    Cq = C // scale
    key = jax.random.PRNGKey(0)
    kx, kwq, kbq, kwk, kbk, kwv, kbv = jax.random.split(key, 7)

    x = jax.random.normal(kx, (B, C, W, H), jnp.float32)
    # 1x1 conv weights stored as (out_ch, in_ch); deterministic synthetic init.
    wq = jax.random.normal(kwq, (Cq, C), jnp.float32) * 0.1
    bq = jax.random.normal(kbq, (Cq,), jnp.float32) * 0.1
    wk = jax.random.normal(kwk, (Cq, C), jnp.float32) * 0.1
    bk = jax.random.normal(kbk, (Cq,), jnp.float32) * 0.1
    wv = jax.random.normal(kwv, (C, C), jnp.float32) * 0.1
    bv = jax.random.normal(kbv, (C,), jnp.float32) * 0.1
    # nn.Parameter(torch.zeros(1)) at init; use a nonzero deterministic value
    # so the kernel output is non-trivial.
    gamma = jnp.float32(0.5)

    out = attention_forward(x, wq, bq, wk, bk, wv, bv, gamma,
                            max_n_tile=max_n_tile)
    out = jax.block_until_ready(out)
    ref = attention_reference(x, wq, bq, wk, bk, wv, bv, gamma)
    np.testing.assert_allclose(np.asarray(out), np.asarray(ref),
                               rtol=1e-4, atol=1e-4)


if __name__ == "__main__":
    # small, module-consistent shapes: in_places must be divisible by scale=8
    _run_case(2, 32, 16, 16, 8, 8192)   # single tile, no padding
    _run_case(1, 32, 40, 25, 8, 256)    # multi-tile + 2-way split + tail padding
    print("KERNEL_OK")
</pallas_src>

<mosaic_0001>
module attributes {stable_mosaic.version = 11 : i64} {
  func.func @_stats_kernel(%arg0: i32, %arg1: i32, %arg2: i32, %arg3: memref<1x32x256xf32, #tpu.memory_space<vmem>>, %arg4: memref<41x32xf32, #tpu.memory_space<vmem>>, %arg5: memref<41x1xf32, #tpu.memory_space<vmem>>, %arg6: memref<1x4x256xf32, #tpu.memory_space<vmem>>, %arg7: memref<1x33x5xf32, #tpu.memory_space<vmem>>) attributes {dimension_semantics = [#tpu.dimension_semantics<parallel>, #tpu.dimension_semantics<parallel>, #tpu.dimension_semantics<arbitrary>], iteration_bounds = array<i64: 2, 1, 1>, scalar_prefetch = 0 : i64, scratch_operands = 0 : i64, tpu.core_type = #tpu.core_type<tc>, window_params = [{transform_indices = @transform_0, window_bounds = array<i64: 1, 32, 256>}, {pipeline_mode = #tpu.pipeline_mode<synchronous>, transform_indices = @transform_1, window_bounds = array<i64: 41, 32>}, {pipeline_mode = #tpu.pipeline_mode<synchronous>, transform_indices = @transform_2, window_bounds = array<i64: 41, 1>}, {transform_indices = @transform_3, window_bounds = array<i64: 1, 4, 256>}, {transform_indices = @transform_4, window_bounds = array<i64: 1, 33, 5>}]} {
    %c0_i32 = arith.constant 0 : i32
    %0 = arith.cmpi eq, %arg2, %c0_i32 : i32
    %1 = arith.extui %0 : i1 to i32
    %c0_i32_0 = arith.constant 0 : i32
    %2 = arith.cmpi ne, %1, %c0_i32_0 : i32
    scf.if %2 {
      %cst_20 = arith.constant 0.000000e+00 : f32
      %37 = vector.broadcast %cst_20 : f32 to vector<1x33x5xf32>
      %c0_21 = arith.constant 0 : index
      %c0_22 = arith.constant 0 : index
      %c0_23 = arith.constant 0 : index
      %38 = vector.load %arg7[%c0_21, %c0_22, %c0_23] : memref<1x33x5xf32, #tpu.memory_space<vmem>>, vector<1x33x5xf32>
      tpu.vector_store %arg7[%c0_21, %c0_22, %c0_23], %37 {strides = array<i32>} : memref<1x33x5xf32, #tpu.memory_space<vmem>>, vector<1x33x5xf32>,
    } else {
    }
    %c0 = arith.constant 0 : index
    %c0_1 = arith.constant 0 : index
    %c0_2 = arith.constant 0 : index
    %3 = vector.load %arg3[%c0, %c0_1, %c0_2] : memref<1x32x256xf32, #tpu.memory_space<vmem>>, vector<1x32x256xf32>
    %4 = vector.shape_cast %3 : vector<1x32x256xf32> to vector<32x256xf32>
    %c0_3 = arith.constant 0 : index
    %c0_4 = arith.constant 0 : index
    %5 = vector.load %arg4[%c0_3, %c0_4] : memref<41x32xf32, #tpu.memory_space<vmem>>, vector<41x32xf32>
    %cst = arith.constant dense<0.000000e+00> : vector<41x256xf32>
    %6 = tpu.matmul %5, %4, %cst {dimension_numbers = #tpu.dot_dimension_numbers<[1], [0], [0], [1], [0, 0, 1, 1], [], []>} : vector<41x32xf32>, vector<32x256xf32>, vector<41x256xf32> -> vector<41x256xf32>
    %c0_5 = arith.constant 0 : index
    %c0_6 = arith.constant 0 : index
    %7 = vector.load %arg5[%c0_5, %c0_6] : memref<41x1xf32, #tpu.memory_space<vmem>>, vector<41x1xf32>
    %8 = vector.broadcast %7 : vector<41x1xf32> to vector<41x256xf32>
    %9 = arith.addf %6, %8 : vector<41x256xf32>
    %10 = vector.extract_strided_slice %9 {offsets = [0, 0], sizes = [4, 256], strides = [1, 1]} : vector<41x256xf32> to vector<4x256xf32>
    %11 = vector.extract_strided_slice %9 {offsets = [4, 0], sizes = [4, 256], strides = [1, 1]} : vector<41x256xf32> to vector<4x256xf32>
    %12 = vector.extract_strided_slice %9 {offsets = [8, 0], sizes = [33, 256], strides = [1, 1]} : vector<41x256xf32> to vector<33x256xf32>
    %13 = arith.mulf %10, %10 : vector<4x256xf32>
    %cst_7 = arith.constant dense<0.000000e+00> : vector<256xf32>
    %14 = vector.multi_reduction <add>, %13, %cst_7 [0] : vector<4x256xf32> to vector<256xf32>
    %15 = vector.shape_cast %14 : vector<256xf32> to vector<1x256xf32>
    %16 = math.rsqrt %15 : vector<1x256xf32>
    %17 = vector.broadcast %16 : vector<1x256xf32> to vector<4x256xf32>
    %18 = arith.mulf %10, %17 : vector<4x256xf32>
    %19 = arith.mulf %11, %11 : vector<4x256xf32>
    %cst_8 = arith.constant dense<0.000000e+00> : vector<256xf32>
    %20 = vector.multi_reduction <add>, %19, %cst_8 [0] : vector<4x256xf32> to vector<256xf32>
    %21 = vector.shape_cast %20 : vector<256xf32> to vector<1x256xf32>
    %22 = math.rsqrt %21 : vector<1x256xf32>
    %23 = vector.broadcast %22 : vector<1x256xf32> to vector<4x256xf32>
    %24 = arith.mulf %11, %23 : vector<4x256xf32>
    %c0_9 = arith.constant 0 : index
    %c0_10 = arith.constant 0 : index
    %c0_11 = arith.constant 0 : index
    %25 = vector.load %arg6[%c0_9, %c0_10, %c0_11] : memref<1x4x256xf32, #tpu.memory_space<vmem>>, vector<1x4x256xf32>
    %26 = vector.shape_cast %25 : vector<1x4x256xf32> to vector<4x256xf32>
    %27 = vector.shape_cast %18 : vector<4x256xf32> to vector<1x4x256xf32>
    tpu.vector_store %arg6[%c0_9, %c0_10, %c0_11], %27 {strides = array<i32>} : memref<1x4x256xf32, #tpu.memory_space<vmem>>, vector<1x4x256xf32>,
    %cst_12 = arith.constant 1.000000e+00 : f32
    %28 = vector.broadcast %cst_12 : f32 to vector<1x256xf32>
    %29 = tpu.concatenate %24, %28 in 0 : vector<4x256xf32>, vector<1x256xf32> -> vector<5x256xf32>
    %cst_13 = arith.constant dense<0.000000e+00> : vector<33x5xf32>
    %30 = tpu.matmul %12, %29, %cst_13 {dimension_numbers = #tpu.dot_dimension_numbers<[1], [1], [0], [0], [0, 0, 1, 0], [], []>} : vector<33x256xf32>, vector<5x256xf32>, vector<33x5xf32> -> vector<33x5xf32>
    %c0_14 = arith.constant 0 : index
    %c0_15 = arith.constant 0 : index
    %c0_16 = arith.constant 0 : index
    %31 = vector.load %arg7[%c0_14, %c0_15, %c0_16] : memref<1x33x5xf32, #tpu.memory_space<vmem>>, vector<1x33x5xf32>
    %32 = vector.shape_cast %31 : vector<1x33x5xf32> to vector<33x5xf32>
    %33 = arith.addf %32, %30 : vector<33x5xf32>
    %c0_17 = arith.constant 0 : index
    %c0_18 = arith.constant 0 : index
    %c0_19 = arith.constant 0 : index
    %34 = vector.load %arg7[%c0_17, %c0_18, %c0_19] : memref<1x33x5xf32, #tpu.memory_space<vmem>>, vector<1x33x5xf32>
    %35 = vector.shape_cast %34 : vector<1x33x5xf32> to vector<33x5xf32>
    %36 = vector.shape_cast %33 : vector<33x5xf32> to vector<1x33x5xf32>
    tpu.vector_store %arg7[%c0_17, %c0_18, %c0_19], %36 {strides = array<i32>} : memref<1x33x5xf32, #tpu.memory_space<vmem>>, vector<1x33x5xf32>,
    return
  }
  func.func @transform_0(%arg0: i32, %arg1: i32, %arg2: i32) -> (i32, i32, i32) {
    %c1_i32 = arith.constant 1 : i32
    %0 = arith.muli %arg1, %c1_i32 : i32
    %1 = arith.addi %0, %arg2 : i32
    %c0_i32 = arith.constant 0 : i32
    %c0_i32_0 = arith.constant 0 : i32
    return %arg0, %c0_i32, %1 : i32, i32, i32
  }
  func.func @transform_1(%arg0: i32, %arg1: i32, %arg2: i32) -> (i32, i32) {
    %c0_i32 = arith.constant 0 : i32
    %c0_i32_0 = arith.constant 0 : i32
    %c0_i32_1 = arith.constant 0 : i32
    return %c0_i32, %c0_i32_0 : i32, i32
  }
  func.func @transform_2(%arg0: i32, %arg1: i32, %arg2: i32) -> (i32, i32) {
    %c0_i32 = arith.constant 0 : i32
    %c0_i32_0 = arith.constant 0 : i32
    %c0_i32_1 = arith.constant 0 : i32
    return %c0_i32, %c0_i32_0 : i32, i32
  }
  func.func @transform_3(%arg0: i32, %arg1: i32, %arg2: i32) -> (i32, i32, i32) {
    %c1_i32 = arith.constant 1 : i32
    %0 = arith.muli %arg1, %c1_i32 : i32
    %1 = arith.addi %0, %arg2 : i32
    %c0_i32 = arith.constant 0 : i32
    %c0_i32_0 = arith.constant 0 : i32
    return %arg0, %c0_i32, %1 : i32, i32, i32
  }
  func.func @transform_4(%arg0: i32, %arg1: i32, %arg2: i32) -> (i32, i32, i32) {
    %c1_i32 = arith.constant 1 : i32
    %0 = arith.muli %arg0, %c1_i32 : i32
    %1 = arith.addi %0, %arg1 : i32
    %c0_i32 = arith.constant 0 : i32
    %c0_i32_0 = arith.constant 0 : i32
    %c0_i32_1 = arith.constant 0 : i32
    return %1, %c0_i32, %c0_i32_0 : i32, i32, i32
  }
}

</mosaic_0001>

<bundles_post_ra>
// kernel: tpu_custom_call.1
= control target key start
LH: loop header
LB: loop body
LE: loop exit
PB: predicated region body
PF: predicated region fallthrough
CT: control target
= control target key end

     0   :  { %10 = vsyncpa [#allocation3], 0  ;;  %s1165_s0 = inlined_call_operand.vmem [shape: f32[2,32,256], index: 0, kind: input, shape index: {}]   ;;  %s1166_s1 = inlined_call_operand.vmem [shape: f32[41,32], index: 1, kind: input, shape index: {}]   ;;  %s1167_s2 = inlined_call_operand.vmem [shape: f32[41,1], index: 2, kind: input, shape index: {}]   ;;  %s1168_s3 = inlined_call_operand.hbm [shape: f32[2,4,256], index: 3, kind: output, shape index: {0}]   ;;  %s1169_s4 = inlined_call_operand.vmem [shape: f32[2,33,5], index: 4, kind: output, shape index: {1}]  }
   0x1   :  { %12 = vsyncpa [#allocation3 + $0x1], 0  ;;  %s948_s15 = smov 0   ;;  %s950_s16 = smov 0  }
   0x2   :  { %s952_s17 = smov 0   ;;  %s954_s18 = smov 0  }
   0x3   :  { %s956_s19 = smov 0   ;;  %s958_s20 = smov 0  }
   0x4 LB: > { %s742_s21 = sadd.s32 4294967295, %s918_s20   ;;  %s743_s22 = sadd.s32 4294967294, %s918_s20   ;;  %s918_s20 = sphi %s958_s20, %s18_s20   ;;  %s914_s19 = sphi %s956_s19, %s1176_s19   ;;  %s910_s18 = sphi %s954_s18, %s1175_s18   ;;  %s906_s17 = sphi %s952_s17, %s1174_s17   ;;  %s902_s16 = sphi %s950_s16, %s1173_s16   ;;  %s898_s15 = sphi %s948_s15, %s1172_s15  }
   0x5   : > { %s37_s23 = sadd.s32 1, %s914_s19  ;;  %s120_s24 = sadd.s32 1, %s906_s17 }
   0x6   : > { %p39_p0 = scmp.ge.s32.totalorder %s37_s23, 2  ;;  %p130_p1 = scmp.ne.s32.totalorder %s906_s17, %s902_s16 }
   0x7   : > { %p131_p2 = scmp.eq.s32.totalorder %s742_s21, 1  ;;  %p136_p3 = scmp.ne.s32.totalorder %s902_s16, %s898_s15 }
   0x8   : > { %s1178_s23 = smov (%p39_p0, %s37_s23), 0  ;;  %p137_p5 = scmp.eq.s32.totalorder %s743_s22, 1 }
   0x9   : > { %p988_p4 = por %p131_p2, %p130_p1  ;;  %s115_s26 = ssub.s32 %s914_s19, %s1178_s23 }
   0xa   : > { %p746_p6 = scmp.ge.s32.totalorder %s918_s20, 1  ;;  %p118_p7 = scmp.eq.s32.totalorder %s115_s26, 0 }
   0xb   : > { %p995_p8 = por %p137_p5, %p136_p3  ;;  %p204_p9 = scmp.lt.s32.totalorder %s918_s20, 3 }
   0xc   : > { %s1001_s28 = scalar_select %p118_p7, %s906_s17, %s120_s24  }
   0xd   : > { %p205_p10 = pnand %p746_p6, %p204_p9 }
   0xe   : > { %p243_p11 = scmp.lt.s32.totalorder (!%p205_p10), %s910_s18, 1  ;;  %v920_v0 = vmov (!%p205_p10), 0.0   ;;  %v921_v1 = vmov (!%p205_p10), 0   ;;  %v287_v2 = vld [vmem:[%s1167_s2] sm:$0xff] (!%p205_p10)  ;;  %v289_v3 = vld [vmem:[%s1167_s2 + $0x10] sm:$0xff] (!%p205_p10)  ;;  %v288_v4 = vld [vmem:[%s1167_s2 + $0x8] sm:$0xff] (!%p205_p10) }
   0xf   : > { %208 = sbr.rel (%p205_p10) target bundleno = 520 (0x208), region = 32  ;;  %406 = vmatprep.mubr.f32.mxu0 (!%p205_p10), %v920_v0  ;;  %830 = vset.pattern.permute.xlu0 (!%p205_p10), %v921_v1  ;;  %v290_v5 = vld [vmem:[%s1167_s2 + $0x18] sm:$0xff] (!%p205_p10)  ;;  %v291_v17 = vld [vmem:[%s1167_s2 + $0x20] sm:$0xff] (!%p205_p10)  ;;  %v292_v18 = vld [vmem:[%s1167_s2 + $0x28] sm:$0x1] (!%p205_p10)  ;;  %vm323_vm0 = vcmask (!%p205_p10), 261120  }
  0x10   : > { %831 = vset.pattern.permute.xlu1 (!%p205_p10), %v921_v1  ;;  %295 = vperm.xlu0 (!%p205_p10), %830, %v287_v2   ;;  %v281_v20 = vld [vmem:[%s1166_s1] sm:$0xff] (!%p205_p10)  ;;  %v282_v21 = vld [vmem:[%s1166_s1 + $0x8] sm:$0xff] (!%p205_p10)  ;;  %v283_v22 = vld [vmem:[%s1166_s1 + $0x10] sm:$0xff] (!%p205_p10)  ;;  %vm266_vm1 = vcmask (!%p205_p10), 39936   ;;  %vm445_vm2 = vcmask (!%p205_p10), 1043456   ;;  %vm271_vm3 = vcmask (!%p205_p10), 32768  }
  0x11   : > { %305 = vperm.xlu1 (!%p205_p10), %831, %v289_v3   ;;  %v284_v23 = vld [vmem:[%s1166_s1 + $0x18] sm:$0xff] (!%p205_p10)  ;;  %v285_v24 = vld [vmem:[%s1166_s1 + $0x20] sm:$0xff] (!%p205_p10)  ;;  %v286_v25 = vld [vmem:[%s1166_s1 + $0x28] sm:$0x1] (!%p205_p10)  ;;  %s922_s21 = smov (!%p205_p10), [#allocation2]  }
  0x12   : > { %s844_s22 = sshll.u32 (!%p205_p10), %s922_s21, 4  ;;  %s845_s22 = int_to_ptr.vmem [resolvable:$false] %s844_s22 }
  0x14   : > { %300 = vperm.xlu0 (!%p205_p10), %830, %v288_v4  }
  0x15   : > { %310 = vperm.xlu1 (!%p205_p10), %831, %v290_v5  }
  0x16   : > { %s1006_s29 = scalar_select %p243_p11, %s910_s18, 1 }
  0x18   : > { %s762_s8 = sshll.u32 %s1006_s29, 6  ;;  %315 = vperm.xlu0 %830, %v291_v17   ;;  %s772_s24 = smul.u32 40, %s1006_s29 }
  0x19   : > { %s250_s13 = scalar_lea.vmem %s1165_s0, %s762_s8  ;;  %320 = vperm.xlu1 %831, %v292_v18   ;;  %s230_s29 = sand.u32 1, %s902_s16  }
  0x1a   : > { %v274_v6 = vld [vmem:[%s250_s13 + $0x8] sm:$0xff]  ;;  %v276_v7 = vld [vmem:[%s250_s13 + $0x18] sm:$0xff]  ;;  %v273_v8 = vld [vmem:[%s250_s13] sm:$0xff]  ;;  %s1063_s5 = scalar_lea.vmem %s1169_s4, %s772_s24  ;;  %s1089_s6 = sshll.u32 %s230_s29, 3 }
  0x1b   : > { %v764_v9 = vpack.c.bf16 %v276_v7, %v274_v6  ;;  %v275_v10 = vld [vmem:[%s250_s13 + $0x10] sm:$0xff]  ;;  %v278_v11 = vld [vmem:[%s250_s13 + $0x28] sm:$0xff]  ;;  %v280_v12 = vld [vmem:[%s250_s13 + $0x38] sm:$0xff]  ;;  %267 = vst.msk [vmem:[%s1063_s5] sm:$0xff] %vm266_vm1, %v920_v0  ;;  %s232_s7 = scalar_lea.vmem [#allocation2], %s1089_s6  ;;  %s763_s8 = sshll.u32 %s910_s18, 7 }
  0x1c   : > { %v766_v13 = vpack.c.bf16 %v275_v10, %v273_v8  ;;  %v768_v14 = vpack.c.bf16 %v280_v12, %v278_v11  ;;  %v277_v15 = vld [vmem:[%s250_s13 + $0x20] sm:$0xff]  ;;  %v279_v16 = vld [vmem:[%s250_s13 + $0x30] sm:$0xff]  ;;  %268 = vst.msk [vmem:[%s1063_s5 + $0x8] sm:$0xff] %vm266_vm1, %v920_v0  ;;  %269 = vst.msk [vmem:[%s1063_s5 + $0x10] sm:$0xff] %vm266_vm1, %v920_v0  ;;  %s632_s9 = sshll.u32 %s232_s7, 4  ;;  %s1107_s12 = scalar_lea.hbm %s1168_s3, %s763_s8  ;;  %s633_s9 = int_to_ptr.vmem [resolvable:$true] %s632_s9 }
  0x1d   : > { %765 = vmatprep.subr.bf16.mxu0 %v764_v9  ;;  %v770_v19 = vpack.c.bf16 %v279_v16, %v277_v15  ;;  %270 = vst.msk [vmem:[%s1063_s5 + $0x18] sm:$0xff] %vm266_vm1, %v920_v0  ;;  %s609_s13 = scalar_lea.sflag [#allocation3], %s230_s29  ;;  %s840_s14 = scalar_lea.vmem %s633_s9, 128 }
  0x1e   : > { %767 = vmatpush1.bf16.msra.mxu0 %v766_v13  ;;  %272 = vst.msk [vmem:[%s1063_s5 + $0x20] sm:$0x1] %vm271_vm3, %v920_v0  ;;  %p841_p12 = scmp.ne.s32.totalorder %s633_s9, %s840_s14  ;;  %s846_s24 = scalar_lea.vmem %s845_s22, 256 }
  0x1f   : > { %769 = vmatprep.subr.bf16.mxu0 %v768_v14  ;;  %p847_p1 = scmp.lt.s32.totalorder %s633_s9, %s845_s22  ;;  %p848_p2 = scmp.lt.s32.totalorder %s846_s24, %s840_s14 }
  0x20   : > { %p842_p13 = pnand %p841_p12, %p988_p4 }
  0x21   : > { %p849_p3 = por %p848_p2, %p847_p1 }
  0x22   : > { %771 = vmatpush1.bf16.msra.mxu0 %v770_v19  ;;  %p843_p0 = pneg %p842_p13 }
  0x24   : > { %p850_p5 = pnand %p849_p3, %p843_p0 }
  0x25   : > { %751 = vmatmul.mubr.msk.f32.vlgmr.msra.gmra.mrb[0].mxu0 %vm323_vm0, %v281_v20 }
  0x26   : > { %412 = vmatprep.mubr.f32.mxu0 %v920_v0 }
  0x29   : > { %752 = vmatmul.mubr.msk.f32.gmra.mrb[2].mxu0 %vm323_vm0, %v282_v21 }
  0x2a   : > { %418 = vmatprep.mubr.f32.mxu0 %v920_v0 }
  0x2d   : > { %753 = vmatmul.mubr.msk.f32.gmra.mrb[4].mxu0 %vm323_vm0, %v283_v22 }
  0x2e   : > { %424 = vmatprep.mubr.f32.mxu0 %v920_v0 }
  0x31   : > { %754 = vmatmul.mubr.msk.f32.gmra.mrb[6].mxu0 %vm323_vm0, %v284_v23 }
  0x32   : > { %430 = vmatprep.mubr.f32.mxu0 %v920_v0 }
  0x35   : > { %755 = vmatmul.mubr.msk.f32.gmra.mrb[8].mxu0 %vm323_vm0, %v285_v24 }
  0x36   : > { %436 = vmatprep.mubr.f32.mxu0 %v920_v0 }
  0x39   : > { %756 = vmatmul.mubr.msk.f32.gmra.mrb[10].mxu0 %vm323_vm0, %v286_v25 }
  0x8f   : > { %v296_v26 = vpop.permute.xlu0 %295 }
  0x90   : > { %v306_v24 = vpop.permute.xlu1 %305 }
  0x93   : > { %v1079_v34 = vpop.permute.xlu0 %300 }
  0xf8   : > { %v408_v27 = vpop.f32.mrb[0].mxu0 }
  0xf9   : > { %v409_v28 = vadd.f32 %v408_v27, %v296_v26  ;;  %v410_v29 = vpop.f32.mrb[1].mxu0 }
  0xfa   : > { %v411_v30 = vadd.f32 %v410_v29, %v296_v26  ;;  %v311_v29 = vpop.permute.xlu1 %310 }
  0xfb   : > { %v443_v31 = vmul.f32 %v409_v28, %v409_v28 }
  0xfc   : > { %v444_v32 = vmul.f32 %v411_v30, %v411_v30  ;;  %v1077_v33 = vpop.f32.mrb[2].mxu0 }
  0xfd   : > { %v446_v35 = vsel %vm445_vm2, %v443_v31, 0.0  ;;  %v466_v36 = vrot.slane %v443_v31, 4  ;;  %v416_v37 = vpop.f32.mrb[3].mxu0  ;;  %v415_v27 = vadd.f32 %v1077_v33, %v1079_v34  ;;  %v316_v31 = vpop.permute.xlu0 %315 }
  0xfe   : > { %v447_v38 = vrot.slane %v446_v35, 4  ;;  %v453_v39 = vsel %vm445_vm2, %v444_v32, 0.0  ;;  %v467_v40 = vrot.slane %v444_v32, 4  ;;  %v417_v41 = vadd.f32 %v416_v37, %v1079_v34 }
  0xff   : > { %v470_v42 = vsel %vm445_vm2, %v466_v36, 0.0  ;;  %v454_v43 = vrot.slane %v453_v39, 4  ;;  %v321_v36 = vpop.permute.xlu1 %320 }
 0x100   : > { %v448_v44 = vadd.f32 %v447_v38, %v446_v35  ;;  %v471_v45 = vrot.slane %v470_v42, 4  ;;  %v477_v46 = vsel %vm445_vm2, %v467_v40, 0.0  ;;  %565 = vmatprep.mubr.f32.mxu1 %v417_v41  ;;  %v420_v47 = vpop.f32.mrb[4].mxu0 }
 0x101   : > { %v455_v48 = vadd.f32 %v454_v43, %v453_v39  ;;  %v478_v49 = vrot.slane %v477_v46, 4  ;;  %v422_v50 = vpop.f32.mrb[5].mxu0 }
 0x102   : > { %v449_v51 = vrot.slane %v448_v44, 2  ;;  %v472_v52 = vadd.f32 %v471_v45, %v470_v42  ;;  %v423_v26 = vadd.f32 %v422_v50, %v306_v24 }
 0x103   : > { %v456_v53 = vrot.slane %v455_v48, 2  ;;  %v479_v54 = vadd.f32 %v478_v49, %v477_v46 }
 0x104   : > { %v450_v55 = vadd.f32 %v449_v51, %v448_v44  ;;  %v473_v56 = vrot.slane %v472_v52, 2  ;;  %v426_v57 = vpop.f32.mrb[6].mxu0 }
 0x105   : > { %v457_v58 = vadd.f32 %v456_v53, %v455_v48  ;;  %v480_v59 = vrot.slane %v479_v54, 2  ;;  %v428_v60 = vpop.f32.mrb[7].mxu0  ;;  %v427_v32 = vadd.f32 %v426_v57, %v311_v29 }
 0x106   : > { %v451_v61 = vrot.slane %v450_v55, 1  ;;  %v474_v62 = vadd.f32 %v473_v56, %v472_v52 }
 0x107   : > { %v458_v63 = vrot.slane %v457_v58, 1  ;;  %v481_v1 = vadd.f32 %v480_v59, %v479_v54 }
 0x108   : > { %v452_v2 = vadd.f32 %v451_v61, %v450_v55  ;;  %v475_v3 = vrot.slane %v474_v62, 1  ;;  %v432_v4 = vpop.f32.mrb[8].mxu0 }
 0x109   : > { %v459_v5 = vadd.f32 %v458_v63, %v457_v58  ;;  %v482_v6 = vrot.slane %v481_v1, 1  ;;  %v434_v7 = vpop.f32.mrb[9].mxu0  ;;  %v433_v37 = vadd.f32 %v432_v4, %v316_v31 }
 0x10a   : > { %832 = vrsqrt.f32 %v452_v2  ;;  %v476_v8 = vadd.f32 %v475_v3, %v474_v62  ;;  %v435_v35 = vadd.f32 %v434_v7, %v316_v31 }
 0x10b   : > { %834 = vrsqrt.f32 %v459_v5  ;;  %v483_v9 = vadd.f32 %v482_v6, %v481_v1 }
 0x10c   : > { %836 = vrsqrt.f32 %v476_v8  ;;  %v438_v10 = vpop.f32.mrb[10].mxu0 }
 0x10d   : > { %838 = vrsqrt.f32 %v483_v9  ;;  %v440_v11 = vpop.f32.mrb[11].mxu0  ;;  %v439_v34 = vadd.f32 %v438_v10, %v321_v36 }
 0x10e   : > { %v441_v33 = vadd.f32 %v440_v11, %v321_v36 }
 0x114   : > { %v833_v12 = vpop.eup %832 }
 0x115   : > { %v835_v13 = vpop.eup %834  ;;  %v462_v14 = vmul.f32 %v833_v12, %v409_v28 }
 0x116   : > { %v837_v15 = vpop.eup %836  ;;  %v463_v16 = vmul.f32 %v835_v13, %v411_v30 }
 0x117   : > { %v839_v17 = vpop.eup %838  ;;  %v486_v18 = vmul.f32 %v837_v15, %v409_v28  ;;  %v421_v28 = vadd.f32 %v420_v47, %v306_v24 }
 0x118   : > { %v487_v19 = vmul.f32 %v839_v17, %v411_v30  ;;  %v490_v20 = vcombine.low %v462_v14, %v463_v16  ;;  %v429_v30 = vadd.f32 %v428_v60, %v311_v29 }
 0x119   : > { %v495_v21 = vrot.slane %v486_v18, 4 }
 0x11a   : > { %v496_v22 = vrot.slane %v487_v19, 4  ;;  %492 = vst [vmem:[%s232_s7] sm:$0xff] %v490_v20 }
 0x11b   : > { %v499_v25 = vsel %vm445_vm2, %v495_v21, 1.0 }
 0x11c   : > { %v500_v23 = vsel %vm445_vm2, %v496_v22, 1.0 }
 0x11d   : > { %501 = vmatprep.subr.mxu1 %v500_v23 }
 0x11e   : > { %502 = vmatpush1.xpose.msra.mxu1 %v499_v25 }
 0x121   : > { %566 = vmatmul.mubr.f32.vlgmr.msra.gmra.mrb[0].mxu1 %v415_v27 }
 0x122   : > { %570 = vmatprep.mubr.f32.mxu1 %v423_v26 }
 0x125   : > { %571 = vmatmul.mubr.f32.gmra.mrb[2].mxu1 %v421_v28 }
 0x126   : > { %575 = vmatprep.mubr.f32.mxu1 %v429_v30 }
 0x129   : > { %576 = vmatmul.mubr.f32.gmra.mrb[4].mxu1 %v427_v32 }
 0x12a   : > { %580 = vmatprep.mubr.f32.mxu1 %v435_v35 }
 0x12d   : > { %581 = vmatmul.mubr.f32.gmra.mrb[6].mxu1 %v433_v37 }
 0x12e   : > { %585 = vmatprep.mubr.f32.mxu1 %v441_v33 }
 0x131   : > { %586 = vmatmul.mubr.f32.gmra.mrb[8].mxu1 %v439_v34 }
 0x132   : > { %853 = shalt.err (!%p850_p5)
}
 0x133   : > { %s854_s18 = scalar_lea.hbm %s1107_s12, 128  ;;  %s858_s29 = scalar_lea.hbm %s1168_s3, 256 }
 0x134   : > { %p855_p6 = scmp.ne.s32.totalorder %s1107_s12, %s854_s18  ;;  %p859_p10 = scmp.lt.u32.totalorder %s1107_s12, %s1168_s3 }
 0x135   : > { %p860_p11 = scmp.lt.u32.totalorder %s858_s29, %s854_s18  ;;  %p862_p13 = scmp.lt.u32.totalorder %s854_s18, %s1107_s12 }
 0x136   : > { %p856_p7 = pnand %p855_p6, %p988_p4 }
 0x137   : > { %p861_p12 = por %p860_p11, %p859_p10 }
 0x138   : > { %p857_p9 = pneg %p856_p7 }
 0x139   : > { %p863_p0 = por %p862_p13, %p861_p12 }
 0x13b   : > { %p864_p1 = pnand %p863_p0, %p857_p9 }
 0x13d   : > { %867 = shalt.err (!%p864_p1)
}
 0x13e   : > { %773 = dma.vmem_to_hbm [thread:$0]  (%p988_p4), %s633_s9, 128, %s1107_s12, %s609_s13   ;;  %v591_v0 = vld [vmem:[%s1063_s5] sm:$0xff]  ;;  %v592_v41 = vld [vmem:[%s1063_s5 + $0x8] sm:$0xff]  ;;  %v593_v45 = vld [vmem:[%s1063_s5 + $0x10] sm:$0xff] }
 0x13f   : > { %v594_v49 = vld [vmem:[%s1063_s5 + $0x18] sm:$0xff]  ;;  %v595_v53 = vld [vmem:[%s1063_s5 + $0x20] sm:$0x1] }
 0x1f4   : > { %v567_v38 = vpop.f32.mrb[0].mxu1 }
 0x1f5   : > { %v596_v39 = vadd.f32 %v591_v0, %v567_v38  ;;  %v569_v40 = vpop.f32.mrb[1].mxu1 }
 0x1f7   : > { %602 = vst.msk [vmem:[%s1063_s5] sm:$0xff] %vm266_vm1, %v596_v39 }
 0x1f8   : > { %v572_v42 = vpop.f32.mrb[2].mxu1 }
 0x1f9   : > { %v597_v43 = vadd.f32 %v592_v41, %v572_v42  ;;  %v574_v44 = vpop.f32.mrb[3].mxu1 }
 0x1fb   : > { %603 = vst.msk [vmem:[%s1063_s5 + $0x8] sm:$0xff] %vm266_vm1, %v597_v43 }
 0x1fc   : > { %v577_v46 = vpop.f32.mrb[4].mxu1 }
 0x1fd   : > { %v598_v47 = vadd.f32 %v593_v45, %v577_v46  ;;  %v579_v48 = vpop.f32.mrb[5].mxu1 }
 0x1ff   : > { %604 = vst.msk [vmem:[%s1063_s5 + $0x10] sm:$0xff] %vm266_vm1, %v598_v47 }
 0x200   : > { %v582_v50 = vpop.f32.mrb[6].mxu1 }
 0x201   : > { %v599_v51 = vadd.f32 %v594_v49, %v582_v50  ;;  %v584_v52 = vpop.f32.mrb[7].mxu1 }
 0x203   : > { %605 = vst.msk [vmem:[%s1063_s5 + $0x18] sm:$0xff] %vm266_vm1, %v599_v51 }
 0x204   : > { %v587_v54 = vpop.f32.mrb[8].mxu1 }
 0x205   : > { %v600_v55 = vadd.f32 %v595_v53, %v587_v54  ;;  %v589_v56 = vpop.f32.mrb[9].mxu1 }
 0x207   : > { %607 = vst.msk [vmem:[%s1063_s5 + $0x20] sm:$0x1] %vm271_vm3, %v600_v55 }
 0x208 PF: > { %p779_p4 = scmp.ge.s32.totalorder %s918_s20, 2  ;;  %s648_s25 = sand.u32 1, %s898_s15  }
 0x209   : > { %s649_s8 = scalar_lea.sflag [#allocation3], %s648_s25 }
 0x20a   : > { %p776_p2 = pnand %p779_p4, %p995_p8 }
 0x20c   : > { %893 = dma.done.wait (!%p776_p2), %s649_s8, 128  }
 0x20d   : > { %895 = vsyncadd (!%p776_p2), %s649_s8, 4294967168  ;;  %s18_s20 = sadd.s32 1, %s918_s20   ;;  %s1172_s15 = smov %s902_s16 }
 0x20e   : > { %p15_p3 = scmp.ge.s32.totalorder %s18_s20, 4   ;;  %s1173_s16 = smov %s906_s17 }
 0x20f   : > { %s1174_s17 = smov %s1001_s28  ;;  %s1175_s18 = smov %s914_s19 }
 0x210   : > { %s1176_s19 = smov %s1178_s23  ;;  %17 = sbr.rel (!%p15_p3) target bundleno = 4 (0x4), region = 83 }
 0x217   :  { %663 = vsyncpa [#allocation3], 1 }
 0x218   :  { %665 = vsyncpa [#allocation3 + $0x1], 1 }

</bundles_post_ra>
